<compile_context>
chip_gen: v5e
topology: v5e:2x2
jax: 0.10.0
libtpu: 0.0.40
codegen_flags: <defaults>
</compile_context>

<pallas_src>
import functools

import jax
import jax.numpy as jnp
import numpy as np
from jax.experimental import pallas as pl
from jax.experimental.pallas import tpu as pltpu


def _pad_channels_kernel(x_ref, o_ref, *, w2, c_in, pad):
    # x_ref block: (B, H2, W2*C)      decimated NHWC image(s), folded lane-dense
    # o_ref block: (B, H2, W2*C_OUT)  with C_OUT = C + 2*pad
    x = x_ref[...]
    if pad == 0:
        o_ref[...] = x
        return
    zeros = jnp.zeros(x.shape[:-1] + (pad,), x.dtype)
    pieces = []
    for k in range(w2):  # output pixel k: [pad zeros | C data lanes | pad zeros]
        pieces.append(zeros)
        pieces.append(x[..., k * c_in:(k + 1) * c_in])
        pieces.append(zeros)
    # Single full-width unmasked store (no zero-then-overwrite partial stores).
    o_ref[...] = jnp.concatenate(pieces, axis=-1)


def _pick_block_n(n, per_image_bytes):
    """Images per grid step: a few MiB payload, VMEM-safe, >= 2 grid steps."""
    target_bytes = 4 << 20      # ~4 MiB of in+out payload per step
    vmem_budget = 12 << 20      # 2x double-buffered tiles must fit v5e's ~16 MiB
    b = min(target_bytes // per_image_bytes,
            vmem_budget // (2 * per_image_bytes))
    b = max(b, 1)
    b = min(b, n)
    if n >= 2:
        b = max(1, min(b, n // 2))   # keep >= 2 "parallel" steps (v7x megacore)
    while n % b:                     # avoid partial (out-of-bounds) blocks
        b -= 1
    return b


def lambda_layer_nhwc_dec(x_dec, pad):
    """Channel zero-pad (pad on each side) of a decimated NHWC tensor via Pallas."""
    n, h2, w2, c = x_dec.shape
    c_out = c + 2 * pad
    dtype_bytes = jnp.dtype(x_dec.dtype).itemsize
    per_image_bytes = h2 * w2 * (c + c_out) * dtype_bytes
    block_n = _pick_block_n(n, per_image_bytes)

    # Metadata-only fold: (N, H2, W2, C) -> (N, H2, W2*C); input is a contiguous
    # NHWC array (materialized by the wrapper transpose).
    x_folded = x_dec.reshape(n, h2, w2 * c)

    kernel = functools.partial(_pad_channels_kernel, w2=w2, c_in=c, pad=pad)
    y_folded = pl.pallas_call(
        kernel,
        out_shape=jax.ShapeDtypeStruct((n, h2, w2 * c_out), x_dec.dtype),
        grid=(n // block_n,),
        in_specs=[pl.BlockSpec((block_n, h2, w2 * c), lambda i: (i, 0, 0))],
        out_specs=pl.BlockSpec((block_n, h2, w2 * c_out), lambda i: (i, 0, 0)),
        compiler_params=pltpu.CompilerParams(
            dimension_semantics=("parallel",)),
        cost_estimate=pl.CostEstimate(
            flops=0, transcendentals=0, bytes_accessed=n * per_image_bytes),
    )(x_folded)
    return y_folded.reshape(n, h2, w2, c_out)


def lambda_layer_nchw(x_nchw, pad):
    """PyTorch-facing wrapper: NCHW in, NCHW out (like the nn.Module forward)."""
    n, c, h, w = x_nchw.shape
    assert h % 2 == 0 and w % 2 == 0, "kernel supports even spatial dims"
    # Fuse the stride-2 decimation into the layout transpose so the Pallas
    # kernel never reads bytes it would discard.
    x_dec_nhwc = jnp.transpose(x_nchw[:, :, ::2, ::2], (0, 2, 3, 1))  # (N,H2,W2,C)
    y_nhwc = lambda_layer_nhwc_dec(x_dec_nhwc, pad)
    return jnp.transpose(y_nhwc, (0, 3, 1, 2))


def _reference_nchw(x_nchw, pad):
    # Pure-JAX reference matching the PyTorch lambda exactly.
    sub = x_nchw[:, :, ::2, ::2]
    return jnp.pad(sub, ((0, 0), (pad, pad), (0, 0), (0, 0)))


if __name__ == "__main__":
    key = jax.random.PRNGKey(0)
    # Small shapes: batch=2, channels=4, spatial=16 (NCHW, like the PyTorch module).
    N, C, H, W = 2, 4, 16, 16
    planes = 2 * C          # typical ResNet shortcut: channel count doubles
    pad = planes // 4       # = 2 zero channels each side -> C_out = 8

    x = jax.random.normal(key, (N, C, H, W), dtype=jnp.float32)

    fn = jax.jit(functools.partial(lambda_layer_nchw, pad=pad))
    y = jax.block_until_ready(fn(x))

    y_ref = _reference_nchw(x, pad)
    np.testing.assert_allclose(np.asarray(y), np.asarray(y_ref), atol=0.0, rtol=0.0)
    assert y.shape == (N, C + 2 * pad, H // 2, W // 2)

    print("KERNEL_OK")
</pallas_src>

<mosaic_0001>
module attributes {stable_mosaic.version = 11 : i64} {
  func.func @_pad_channels_kernel(%arg0: i32, %arg1: memref<1x8x32xf32, #tpu.memory_space<vmem>>, %arg2: memref<1x8x64xf32, #tpu.memory_space<vmem>>) attributes {dimension_semantics = [#tpu.dimension_semantics<parallel>], iteration_bounds = array<i64: 2>, scalar_prefetch = 0 : i64, scratch_operands = 0 : i64, tpu.core_type = #tpu.core_type<tc>, window_params = [{transform_indices = @transform_0, window_bounds = array<i64: 1, 8, 32>}, {transform_indices = @transform_1, window_bounds = array<i64: 1, 8, 64>}]} {
    %c0 = arith.constant 0 : index
    %c0_0 = arith.constant 0 : index
    %c0_1 = arith.constant 0 : index
    %0 = vector.load %arg1[%c0, %c0_0, %c0_1] : memref<1x8x32xf32, #tpu.memory_space<vmem>>, vector<1x8x32xf32>
    %cst = arith.constant 0.000000e+00 : f32
    %1 = vector.broadcast %cst : f32 to vector<1x8x2xf32>
    %2 = vector.extract_strided_slice %0 {offsets = [0, 0, 0], sizes = [1, 8, 4], strides = [1, 1, 1]} : vector<1x8x32xf32> to vector<1x8x4xf32>
    %3 = vector.extract_strided_slice %0 {offsets = [0, 0, 4], sizes = [1, 8, 4], strides = [1, 1, 1]} : vector<1x8x32xf32> to vector<1x8x4xf32>
    %4 = vector.extract_strided_slice %0 {offsets = [0, 0, 8], sizes = [1, 8, 4], strides = [1, 1, 1]} : vector<1x8x32xf32> to vector<1x8x4xf32>
    %5 = vector.extract_strided_slice %0 {offsets = [0, 0, 12], sizes = [1, 8, 4], strides = [1, 1, 1]} : vector<1x8x32xf32> to vector<1x8x4xf32>
    %6 = vector.extract_strided_slice %0 {offsets = [0, 0, 16], sizes = [1, 8, 4], strides = [1, 1, 1]} : vector<1x8x32xf32> to vector<1x8x4xf32>
    %7 = vector.extract_strided_slice %0 {offsets = [0, 0, 20], sizes = [1, 8, 4], strides = [1, 1, 1]} : vector<1x8x32xf32> to vector<1x8x4xf32>
    %8 = vector.extract_strided_slice %0 {offsets = [0, 0, 24], sizes = [1, 8, 4], strides = [1, 1, 1]} : vector<1x8x32xf32> to vector<1x8x4xf32>
    %9 = vector.extract_strided_slice %0 {offsets = [0, 0, 28], sizes = [1, 8, 4], strides = [1, 1, 1]} : vector<1x8x32xf32> to vector<1x8x4xf32>
    %10 = tpu.concatenate %1, %2, %1, %1, %3, %1, %1, %4, %1, %1, %5, %1, %1, %6, %1, %1 in 2 : vector<1x8x2xf32>, vector<1x8x4xf32>, vector<1x8x2xf32>, vector<1x8x2xf32>, vector<1x8x4xf32>, vector<1x8x2xf32>, vector<1x8x2xf32>, vector<1x8x4xf32>, vector<1x8x2xf32>, vector<1x8x2xf32>, vector<1x8x4xf32>, vector<1x8x2xf32>, vector<1x8x2xf32>, vector<1x8x4xf32>, vector<1x8x2xf32>, vector<1x8x2xf32> -> vector<1x8x42xf32>
    %11 = tpu.concatenate %7, %1, %1, %8, %1, %1, %9, %1 in 2 : vector<1x8x4xf32>, vector<1x8x2xf32>, vector<1x8x2xf32>, vector<1x8x4xf32>, vector<1x8x2xf32>, vector<1x8x2xf32>, vector<1x8x4xf32>, vector<1x8x2xf32> -> vector<1x8x22xf32>
    %12 = tpu.concatenate %10, %11 in 2 : vector<1x8x42xf32>, vector<1x8x22xf32> -> vector<1x8x64xf32>
    %c0_2 = arith.constant 0 : index
    %c0_3 = arith.constant 0 : index
    %c0_4 = arith.constant 0 : index
    %13 = vector.load %arg2[%c0_2, %c0_3, %c0_4] : memref<1x8x64xf32, #tpu.memory_space<vmem>>, vector<1x8x64xf32>
    tpu.vector_store %arg2[%c0_2, %c0_3, %c0_4], %12 {strides = array<i32>} : memref<1x8x64xf32, #tpu.memory_space<vmem>>, vector<1x8x64xf32>,
    return
  }
  func.func @transform_0(%arg0: i32) -> (i32, i32, i32) {
    %c0_i32 = arith.constant 0 : i32
    %c0_i32_0 = arith.constant 0 : i32
    %c0_i32_1 = arith.constant 0 : i32
    return %arg0, %c0_i32, %c0_i32_0 : i32, i32, i32
  }
  func.func @transform_1(%arg0: i32) -> (i32, i32, i32) {
    %c0_i32 = arith.constant 0 : i32
    %c0_i32_0 = arith.constant 0 : i32
    %c0_i32_1 = arith.constant 0 : i32
    return %arg0, %c0_i32, %c0_i32_0 : i32, i32, i32
  }
}

</mosaic_0001>

<bundles_post_ra>
// kernel: lambda_layer_nchw.1
= control target key start
LH: loop header
LB: loop body
LE: loop exit
PB: predicated region body
PF: predicated region fallthrough
CT: control target
= control target key end

     0   :  { %s292_s6 = smov 0   ;;  %s320_s0 = inlined_call_operand.vmem [shape: f32[2,8,32], index: 0, kind: input, shape index: {}]   ;;  %s321_s1 = inlined_call_operand.vmem [shape: f32[2,8,64], index: 1, kind: output, shape index: {}]  }
   0x1 LB: > { %s239_s7 = sadd.s32 4294967295, %s271_s6   ;;  %p243_p0 = scmp.ge.s32.totalorder %s271_s6, 1  ;;  %s271_s6 = sphi %s292_s6, %s11_s6  }
   0x2   : > { %p86_p1 = scmp.lt.s32.totalorder %s271_s6, 3 }
   0x4   : > { %p87_p2 = pnand %p243_p0, %p86_p1 }
   0x5   : > { %p104_p3 = scmp.lt.s32.totalorder (!%p87_p2), %s239_s7, 1  ;;  %s273_s12 = smov (!%p87_p2), 108  }
   0x6   : > { %90 = sbr.rel (%p87_p2) target bundleno = 236 (0xec), region = 24  ;;  %s274_s13 = smov (!%p87_p2), 116  }
   0x7   : > { %s275_s14 = smov (!%p87_p2), 6   ;;  %s276_s15 = smov (!%p87_p2), 112  }
   0x8   : > { %s277_s16 = smov (!%p87_p2), 2   ;;  %s278_s17 = smov (!%p87_p2), 10  }
   0x9   : > { %s279_s18 = smov (!%p87_p2), 14   ;;  %s280_s19 = smov (!%p87_p2), 18  }
   0xa   : > { %s281_s20 = smov (!%p87_p2), 42  }
   0xb   : > { %s323_s7 = smov (!%p104_p3, %s239_s7), 1  ;;  %vm168_vm0 = vcmask 31744   ;;  %vm131_vm1 = vcmask 48128   ;;  %vm133_vm2 = vcmask 64512   ;;  %vm129_vm3 = vcmask 15360  }
   0xc   : > { %s244_s8 = sshll.u32 %s323_s7, 3  ;;  %vm172_vm4 = vcmask 97280   ;;  %vm137_vm5 = vcmask 113664   ;;  %vm139_vm6 = vcmask 130048   ;;  %vm135_vm7 = vcmask 80896  }
   0xd   : > { %s107_s11 = scalar_lea.vmem %s320_s0, %s244_s8  ;;  %vm176_vm8 = vcmask 162816   ;;  %vm141_vm9 = vcmask 146432   ;;  %vm143_vm10 = vcmask 179200   ;;  %vm145_vm11 = vcmask 195584   ;;  %s111_s23 = scalar_lea.vmem %s321_s1, %s244_s8 }
   0xe   : > { %v112_v0 = vld [vmem:[%s107_s11] sm:$0xff]  ;;  %vm147_vm12 = vcmask 211968   ;;  %vm149_vm13 = vcmask 244736   ;;  %vm151_vm14 = vcmask 261120   ;;  %vm153_vm15 = vcmask 277504  }
   0xf   : > { %159 = vrot.lane.b32.xlu0 %v112_v0, %s273_s12  ;;  %165 = vrot.lane.b32.xlu1 %v112_v0, %s274_s13 }
  0x10   : > { %117 = vrot.lane.b32.xlu2 %v112_v0, %s275_s14 }
  0x17   : > { %162 = vrot.lane.b32.xlu0 %v112_v0, %s276_s15  ;;  %114 = vrot.lane.b32.xlu1 %v112_v0, %s277_s16 }
  0x18   : > { %120 = vrot.lane.b32.xlu2 %v112_v0, %s278_s17 }
  0x1f   : > { %123 = vrot.lane.b32.xlu0 %v112_v0, %s279_s18  ;;  %126 = vrot.lane.b32.xlu1 %v112_v0, %s280_s19 }
  0x6a   : > { %v118_v12 = vpop.permute.xlu2 %117 }
  0x72   : > { %v121_v19 = vpop.permute.xlu2 %120 }
  0x81   : > { %v160_v1 = vpop.permute.xlu0 %159  ;;  %v166_v2 = vpop.permute.xlu1 %165 }
  0x82   : > { %v169_v3 = vsel %vm168_vm0, %v160_v1, 0.0  ;;  %vm155_vm0 = vcmask 310272  }
  0x83   : > { %v170_v4 = vsel %vm131_vm1, %v169_v3, 0.0 }
  0x89   : > { %v163_v5 = vpop.permute.xlu0 %162  ;;  %v115_v6 = vpop.permute.xlu1 %114 }
  0x8a   : > { %v171_v7 = vsel %vm133_vm2, %v170_v4, %v163_v5  ;;  %v130_v8 = vsel %vm129_vm3, 0.0, %v115_v6  ;;  %vm184_vm3 = vcmask 523264  }
  0x8b   : > { %v173_v9 = vsel %vm172_vm4, %v171_v7, 0.0  ;;  %v132_v10 = vsel %vm131_vm1, %v130_v8, 0.0  ;;  %vm157_vm1 = vcmask 326656  }
  0x8c   : > { %v174_v11 = vsel %vm137_vm5, %v173_v9, 0.0  ;;  %v134_v13 = vsel %vm133_vm2, %v132_v10, 0.0  ;;  %vm182_vm2 = vcmask 343040  }
  0x8d   : > { %v175_v14 = vsel %vm139_vm6, %v174_v11, %v166_v2  ;;  %v136_v15 = vsel %vm135_vm7, %v134_v13, %v118_v12 }
  0x8e   : > { %v177_v16 = vsel %vm176_vm8, %v175_v14, 0.0  ;;  %v138_v17 = vsel %vm137_vm5, %v136_v15, 0.0 }
  0x8f   : > { %179 = vrot.lane.b32.xlu2 %v177_v16, %s281_s20  ;;  %v140_v18 = vsel %vm139_vm6, %v138_v17, 0.0 }
  0x90   : > { %v142_v20 = vsel %vm141_vm9, %v140_v18, %v121_v19 }
  0x91   : > { %v144_v21 = vsel %vm143_vm10, %v142_v20, 0.0  ;;  %v124_v23 = vpop.permute.xlu0 %123  ;;  %v127_v27 = vpop.permute.xlu1 %126 }
  0x92   : > { %v146_v22 = vsel %vm145_vm11, %v144_v21, 0.0 }
  0x93   : > { %v148_v24 = vsel %vm147_vm12, %v146_v22, %v124_v23 }
  0x94   : > { %v150_v25 = vsel %vm149_vm13, %v148_v24, 0.0 }
  0x95   : > { %v152_v26 = vsel %vm151_vm14, %v150_v25, 0.0 }
  0x96   : > { %v154_v28 = vsel %vm153_vm15, %v152_v26, %v127_v27 }
  0x97   : > { %v156_v29 = vsel %vm155_vm0, %v154_v28, 0.0 }
  0x98   : > { %v158_v30 = vsel %vm157_vm1, %v156_v29, 0.0 }
  0xe9   : > { %v180_v31 = vpop.permute.xlu2 %179 }
  0xea   : > { %v183_v32 = vsel %vm182_vm2, %v158_v30, %v180_v31 }
  0xeb   : > { %185 = vst.msk [vmem:[%s111_s23] sm:$0xff] %vm184_vm3, %v183_v32 }
  0xec PF: > { %s11_s6 = sadd.s32 1, %s271_s6  }
  0xed   : > { %p8_p4 = scmp.ge.s32.totalorder %s11_s6, 4  }
  0xef   :  { %10 = sbr.rel (!%p8_p4) target bundleno = 1 (0x1), region = 54 }

</bundles_post_ra>
